<compile_context>
chip_gen: v5e
topology: v5e:2x2
jax: 0.10.0
libtpu: 0.0.40
codegen_flags: <defaults>
</compile_context>

<pallas_src>
import functools
import math

import jax
import jax.numpy as jnp
import numpy as np
from jax import lax
from jax.experimental import pallas as pl
from jax.experimental.pallas import tpu as pltpu

_NEG_INF = -1e30   # finite "minus infinity" for the running max (NaN-safe)
_MASK_PAD = -1e9   # additive mask value for padded key columns


# ---------------------------------------------------------------------------
# Kernel 1: one-shot K/V projection into head-major bf16 layout.
# ---------------------------------------------------------------------------
def _kv_proj_kernel(x_ref, wkv_ref, bkv_ref, k_ref, v_ref, *, n_heads, d_heads):
    # x_ref:   (1, ts, H)  hidden_states row tile (f32)
    # wkv_ref: (n_heads, H, 2*d)  bf16 [Wk_h | Wv_h]
    # bkv_ref: (n_heads, 1, 2*d)  f32
    # k_ref / v_ref: (n_heads, ts, d)  bf16 head-major outputs
    x = x_ref[0].astype(jnp.bfloat16)                         # (ts, H)
    for h in range(n_heads):                                  # static, once per tile
        kv = jnp.dot(x, wkv_ref[h], preferred_element_type=jnp.float32)
        kv = kv + bkv_ref[h]                                  # (ts, 2*d) f32
        k_ref[h] = kv[:, :d_heads].astype(k_ref.dtype)
        v_ref[h] = kv[:, d_heads:].astype(v_ref.dtype)


# ---------------------------------------------------------------------------
# Kernel 2: flash-style attention with hoisted Q projection + residual add.
# ---------------------------------------------------------------------------
def _flash_attn_kernel(x_ref, mask_ref, k_ref, v_ref, wq_ref, bq_ref, o_ref,
                       q_sc, m_sc, l_sc, acc_sc, *, n_heads, d_heads):
    # x_ref:    (1, tq, H)         query rows (f32; also the residual)
    # mask_ref: (1, 1, tq, tk)     additive mask tile (bf16)
    # k_ref:    (n_heads, tk, d)   bf16 precomputed keys (head-major)
    # v_ref:    (n_heads, tk, d)   bf16 precomputed values
    # wq_ref:   (n_heads, H, d)    bf16 Wq * scale (head-major)
    # bq_ref:   (n_heads, 1, d)    f32  bq * scale
    # o_ref:    (1, tq, H)
    # q_sc:     (n_heads, tq, d)   bf16   (Q cache, filled once per q tile)
    # m_sc/l_sc:(n_heads, tq, 1)   f32 ;  acc_sc: (n_heads, tq, d) f32
    ki = pl.program_id(2)
    nk = pl.num_programs(2)

    @pl.when(ki == 0)
    def _init():
        m_sc[...] = jnp.full(m_sc.shape, _NEG_INF, dtype=jnp.float32)
        l_sc[...] = jnp.zeros(l_sc.shape, dtype=jnp.float32)
        acc_sc[...] = jnp.zeros(acc_sc.shape, dtype=jnp.float32)
        # Q projection, once per q tile (hoisted out of the kv loop).
        xq = x_ref[0].astype(jnp.bfloat16)                    # (tq, H)
        for h in range(n_heads):
            qh = jnp.dot(xq, wq_ref[h], preferred_element_type=jnp.float32)
            q_sc[h] = (qh + bq_ref[h]).astype(jnp.bfloat16)   # scale pre-folded

    mask = mask_ref[0, 0].astype(jnp.float32)                 # (tq, tk)

    def head_step(h, carry):
        qh = q_sc[h]                                          # (tq, d) bf16
        kh = k_ref[h]                                         # (tk, d) bf16
        vh = v_ref[h]                                         # (tk, d) bf16
        # q @ k^T without materializing a transpose (contract last dims).
        logits = lax.dot_general(qh, kh, (((1,), (1,)), ((), ())),
                                 preferred_element_type=jnp.float32)  # (tq, tk)
        logits = logits + mask
        # Online (flash) softmax update for this head.
        m_prev = m_sc[h]                                      # (tq, 1)
        m_new = jnp.maximum(m_prev, jnp.max(logits, axis=-1, keepdims=True))
        alpha = jnp.exp(m_prev - m_new)
        p = jnp.exp(logits - m_new)                           # (tq, tk) f32
        l_sc[h] = alpha * l_sc[h] + jnp.sum(p, axis=-1, keepdims=True)
        acc_sc[h] = alpha * acc_sc[h] + jnp.dot(
            p.astype(jnp.bfloat16), vh, preferred_element_type=jnp.float32)
        m_sc[h] = m_new
        return carry

    # fori_loop (not a Python unroll) bounds vreg live ranges per head.
    lax.fori_loop(0, n_heads, head_step, 0)

    @pl.when(ki == nk - 1)
    def _finalize():
        pieces = []
        for h in range(n_heads):
            # epsilon clamp protects fully-masked / padded query rows.
            inv_l = pl.reciprocal(jnp.maximum(l_sc[h], 1e-20), approx=True)
            pieces.append(acc_sc[h] * inv_l)                  # (tq, d)
        ctx = jnp.concatenate(pieces, axis=-1)                # (tq, H), once per tile
        o_ref[0] = (x_ref[0].astype(jnp.float32) + ctx).astype(o_ref.dtype)


# ---------------------------------------------------------------------------
# Host-side helpers + wrapper.
# ---------------------------------------------------------------------------
def _per_head(w, n_heads, d_heads):
    """(H, n_heads*d) -> head-major (n_heads, H, d)."""
    H = w.shape[0]
    return jnp.transpose(w.reshape(H, n_heads, d_heads), (1, 0, 2))


def _vmem_limit_bytes():
    # Derive the scoped-VMEM limit from the actual chip (64 MiB on v7x,
    # 128 MiB on v5e/v6e), leaving headroom; fall back to 64 MiB.
    try:
        cap = pltpu.get_tpu_info().vmem_capacity_bytes
        return int(min(cap - (8 << 20), 100 << 20))
    except Exception:
        return 64 << 20


def _default_tile(seq_len):
    # Full-extent block for short sequences (always legal); 256 otherwise
    # (good on v6e/v5e, fits v7x's 64 MiB budget).  Long, non-multiple S is
    # handled by padding in the wrapper, never by a (S, S) fallback block.
    return seq_len if seq_len <= 256 else 256


def self_attention(hidden_states, attention_mask, params, *, n_heads, d_heads,
                   q_tile=None, kv_tile=None):
    """hidden_states: [B, S, H]; attention_mask: additive [B, 1, S, S]."""
    B, S, H = hidden_states.shape
    qkv = n_heads * d_heads
    if qkv != H:
        raise ValueError("residual add requires hidden_dim == n_heads * d_heads")
    scale = 1.0 / (d_heads ** 0.5)
    dt = hidden_states.dtype
    wq, bq, wk, bk, wv, bv = params

    # Head-major bf16 weights; softmax scale folded into the Q projection.
    wq_h = (_per_head(wq, n_heads, d_heads) * scale).astype(jnp.bfloat16)
    bq_h = (bq * scale).reshape(n_heads, 1, d_heads).astype(jnp.float32)
    wkv_h = jnp.concatenate([_per_head(wk, n_heads, d_heads),
                             _per_head(wv, n_heads, d_heads)],
                            axis=-1).astype(jnp.bfloat16)        # (nh, H, 2d)
    bkv_h = jnp.concatenate([bk.reshape(n_heads, 1, d_heads),
                             bv.reshape(n_heads, 1, d_heads)],
                            axis=-1).astype(jnp.float32)          # (nh, 1, 2d)

    tq = _default_tile(S) if q_tile is None else q_tile
    tk = _default_tile(S) if kv_tile is None else kv_tile
    blk = math.lcm(tq, tk)
    S_pad = ((S + blk - 1) // blk) * blk

    x = hidden_states
    mask = attention_mask.astype(jnp.bfloat16)   # halve the O(B*S^2) HBM read
    if S_pad != S:
        pad = S_pad - S
        x = jnp.pad(x, ((0, 0), (0, pad), (0, 0)))
        mask = jnp.pad(mask, ((0, 0), (0, 0), (0, pad), (0, pad)),
                       constant_values=_MASK_PAD)

    nq, nk = S_pad // tq, S_pad // tk
    vmem_limit = _vmem_limit_bytes()

    # ---- K/V projection (computed exactly once, head-major bf16) ----------
    kv_proj = functools.partial(_kv_proj_kernel, n_heads=n_heads, d_heads=d_heads)
    proj_cost = pl.CostEstimate(
        flops=int(2 * B * S_pad * H * 2 * qkv),
        transcendentals=0,
        bytes_accessed=int(B * S_pad * H * jnp.dtype(dt).itemsize
                           + 2 * B * S_pad * qkv * 2
                           + wkv_h.size * 2 + bkv_h.size * 4))
    k_hm, v_hm = pl.pallas_call(
        kv_proj,
        out_shape=(jax.ShapeDtypeStruct((B * n_heads, S_pad, d_heads), jnp.bfloat16),
                   jax.ShapeDtypeStruct((B * n_heads, S_pad, d_heads), jnp.bfloat16)),
        grid_spec=pltpu.PrefetchScalarGridSpec(
            num_scalar_prefetch=0,
            grid=(B, nk),
            in_specs=[
                pl.BlockSpec((1, tk, H), lambda b, si: (b, si, 0)),
                pl.BlockSpec((n_heads, H, 2 * d_heads), lambda b, si: (0, 0, 0),
                             pipeline_mode=pl.Buffered(1)),        # constant weights
                pl.BlockSpec((n_heads, 1, 2 * d_heads), lambda b, si: (0, 0, 0),
                             pipeline_mode=pl.Buffered(1)),
            ],
            out_specs=[
                pl.BlockSpec((n_heads, tk, d_heads), lambda b, si: (b, si, 0)),
                pl.BlockSpec((n_heads, tk, d_heads), lambda b, si: (b, si, 0)),
            ]),
        compiler_params=pltpu.CompilerParams(
            dimension_semantics=("parallel", "parallel"),
            vmem_limit_bytes=vmem_limit),
        cost_estimate=proj_cost,
    )(x, wkv_h, bkv_h)

    # ---- Flash attention + residual ---------------------------------------
    flash = functools.partial(_flash_attn_kernel, n_heads=n_heads, d_heads=d_heads)
    flops = 2 * B * S_pad * H * qkv + 4 * B * n_heads * S_pad * S_pad * d_heads
    transcendentals = B * n_heads * S_pad * S_pad
    bytes_accessed = (2 * B * S_pad * H * jnp.dtype(dt).itemsize    # x in + out
                      + B * S_pad * S_pad * 2                       # mask (bf16)
                      + nq * 2 * B * qkv * S_pad * 2                # K/V re-stream
                      + wq_h.size * 2 + bq_h.size * 4)              # weights
    out = pl.pallas_call(
        flash,
        out_shape=jax.ShapeDtypeStruct((B, S_pad, H), dt),
        grid_spec=pltpu.PrefetchScalarGridSpec(
            num_scalar_prefetch=0,
            grid=(B, nq, nk),
            in_specs=[
                pl.BlockSpec((1, tq, H), lambda b, qi, ki: (b, qi, 0)),          # x / residual
                pl.BlockSpec((1, 1, tq, tk), lambda b, qi, ki: (b, 0, qi, ki)),  # mask tile
                pl.BlockSpec((n_heads, tk, d_heads), lambda b, qi, ki: (b, ki, 0)),  # K
                pl.BlockSpec((n_heads, tk, d_heads), lambda b, qi, ki: (b, ki, 0)),  # V
                pl.BlockSpec((n_heads, H, d_heads), lambda b, qi, ki: (0, 0, 0),
                             pipeline_mode=pl.Buffered(1)),                       # Wq*scale
                pl.BlockSpec((n_heads, 1, d_heads), lambda b, qi, ki: (0, 0, 0),
                             pipeline_mode=pl.Buffered(1)),                       # bq*scale
            ],
            out_specs=pl.BlockSpec((1, tq, H), lambda b, qi, ki: (b, qi, 0)),
            scratch_shapes=[
                pltpu.VMEM((n_heads, tq, d_heads), jnp.bfloat16),  # cached Q
                pltpu.VMEM((n_heads, tq, 1), jnp.float32),         # running max
                pltpu.VMEM((n_heads, tq, 1), jnp.float32),         # running denom
                pltpu.VMEM((n_heads, tq, d_heads), jnp.float32),   # running context
            ]),
        compiler_params=pltpu.CompilerParams(
            dimension_semantics=("parallel", "parallel", "arbitrary"),
            vmem_limit_bytes=vmem_limit),
        cost_estimate=pl.CostEstimate(flops=int(flops),
                                      transcendentals=int(transcendentals),
                                      bytes_accessed=int(bytes_accessed)),
    )(x, mask, k_hm, v_hm, wq_h, bq_h)

    if S_pad != S:
        out = out[:, :S, :]
    return out


# ---------------------------------------------------------------------------
# Pure-JAX reference mirroring the PyTorch forward (eval mode).
# ---------------------------------------------------------------------------
def _reference(hidden_states, attention_mask, params, *, n_heads, d_heads):
    wq, bq, wk, bk, wv, bv = params
    B, S, H = hidden_states.shape
    scale = 1.0 / (d_heads ** 0.5)
    q = hidden_states @ wq + bq
    k = hidden_states @ wk + bk
    v = hidden_states @ wv + bv

    def split(t):
        return t.reshape(B, S, n_heads, d_heads).transpose(0, 2, 1, 3)

    q, k, v = split(q), split(k), split(v)
    attn = jnp.einsum("bhqd,bhkd->bhqk", q, k) * scale
    attn = attn + attention_mask          # broadcast over heads
    attn = jax.nn.softmax(attn, axis=-1)
    ctx = jnp.einsum("bhqk,bhkd->bhqd", attn, v)
    ctx = ctx.transpose(0, 2, 1, 3).reshape(B, S, n_heads * d_heads)
    return ctx + hidden_states


if __name__ == "__main__":
    B, S = 2, 8
    n_heads, d_heads = 4, 8
    H = n_heads * d_heads  # hidden_dim = 32

    key = jax.random.PRNGKey(0)
    kx, km, k1, k2, k3, k4, k5, k6 = jax.random.split(key, 8)

    hidden_states = jax.random.normal(kx, (B, S, H), dtype=jnp.float32)
    # additive mask: non-trivial small values (broadcast over heads)
    attention_mask = 0.1 * jax.random.normal(km, (B, 1, S, S), dtype=jnp.float32)

    init = 0.02
    params = (
        init * jax.random.normal(k1, (H, H), dtype=jnp.float32),  # Wq
        init * jax.random.normal(k2, (H,), dtype=jnp.float32),    # bq
        init * jax.random.normal(k3, (H, H), dtype=jnp.float32),  # Wk
        init * jax.random.normal(k4, (H,), dtype=jnp.float32),    # bk
        init * jax.random.normal(k5, (H, H), dtype=jnp.float32),  # Wv
        init * jax.random.normal(k6, (H,), dtype=jnp.float32),    # bv
    )

    out = self_attention(hidden_states, attention_mask, params,
                         n_heads=n_heads, d_heads=d_heads)
    out = jax.block_until_ready(out)

    ref = _reference(hidden_states, attention_mask, params,
                     n_heads=n_heads, d_heads=d_heads)
    # bf16 MXU inputs (f32 accumulation / softmax) -> slightly looser tolerance.
    np.testing.assert_allclose(np.asarray(out), np.asarray(ref),
                               rtol=5e-3, atol=5e-3)
    print("KERNEL_OK")
</pallas_src>

<mosaic_0001>
module attributes {stable_mosaic.version = 11 : i64} {
  func.func @_kv_proj_kernel(%arg0: i32, %arg1: i32, %arg2: memref<1x8x32xf32, #tpu.memory_space<vmem>>, %arg3: memref<4x32x16xbf16, #tpu.memory_space<vmem>>, %arg4: memref<4x1x16xf32, #tpu.memory_space<vmem>>, %arg5: memref<4x8x8xbf16, #tpu.memory_space<vmem>>, %arg6: memref<4x8x8xbf16, #tpu.memory_space<vmem>>) attributes {dimension_semantics = [#tpu.dimension_semantics<parallel>, #tpu.dimension_semantics<parallel>], iteration_bounds = array<i64: 2, 1>, scalar_prefetch = 0 : i64, scratch_operands = 0 : i64, tpu.core_type = #tpu.core_type<tc>, window_params = [{transform_indices = @transform_0, window_bounds = array<i64: 1, 8, 32>}, {pipeline_mode = #tpu.pipeline_mode<synchronous>, transform_indices = @transform_1, window_bounds = array<i64: 4, 32, 16>}, {pipeline_mode = #tpu.pipeline_mode<synchronous>, transform_indices = @transform_2, window_bounds = array<i64: 4, 1, 16>}, {transform_indices = @transform_3, window_bounds = array<i64: 4, 8, 8>}, {transform_indices = @transform_4, window_bounds = array<i64: 4, 8, 8>}]} {
    %c0 = arith.constant 0 : index
    %c0_0 = arith.constant 0 : index
    %c0_1 = arith.constant 0 : index
    %0 = vector.load %arg2[%c0, %c0_0, %c0_1] : memref<1x8x32xf32, #tpu.memory_space<vmem>>, vector<1x8x32xf32>
    %1 = vector.shape_cast %0 : vector<1x8x32xf32> to vector<8x32xf32>
    %2 = arith.truncf %1 : vector<8x32xf32> to vector<8x32xbf16>
    %c0_2 = arith.constant 0 : index
    %c0_3 = arith.constant 0 : index
    %c0_4 = arith.constant 0 : index
    %3 = vector.load %arg3[%c0_2, %c0_3, %c0_4] : memref<4x32x16xbf16, #tpu.memory_space<vmem>>, vector<1x32x16xbf16>
    %4 = vector.shape_cast %3 : vector<1x32x16xbf16> to vector<32x16xbf16>
    %cst = arith.constant dense<0.000000e+00> : vector<8x16xf32>
    %5 = tpu.matmul %2, %4, %cst {dimension_numbers = #tpu.dot_dimension_numbers<[1], [0], [0], [1], [0, 0, 1, 1], [], []>} : vector<8x32xbf16>, vector<32x16xbf16>, vector<8x16xf32> -> vector<8x16xf32>
    %c0_5 = arith.constant 0 : index
    %c0_6 = arith.constant 0 : index
    %c0_7 = arith.constant 0 : index
    %6 = vector.load %arg4[%c0_5, %c0_6, %c0_7] : memref<4x1x16xf32, #tpu.memory_space<vmem>>, vector<1x1x16xf32>
    %7 = vector.shape_cast %6 : vector<1x1x16xf32> to vector<1x16xf32>
    %8 = vector.broadcast %7 : vector<1x16xf32> to vector<8x16xf32>
    %9 = arith.addf %5, %8 : vector<8x16xf32>
    %10 = vector.extract_strided_slice %9 {offsets = [0, 0], sizes = [8, 8], strides = [1, 1]} : vector<8x16xf32> to vector<8x8xf32>
    %11 = arith.truncf %10 : vector<8x8xf32> to vector<8x8xbf16>
    %c0_8 = arith.constant 0 : index
    %c0_9 = arith.constant 0 : index
    %c0_10 = arith.constant 0 : index
    %12 = vector.load %arg5[%c0_8, %c0_9, %c0_10] : memref<4x8x8xbf16, #tpu.memory_space<vmem>>, vector<1x8x8xbf16>
    %13 = vector.shape_cast %12 : vector<1x8x8xbf16> to vector<8x8xbf16>
    %14 = vector.shape_cast %11 : vector<8x8xbf16> to vector<1x8x8xbf16>
    tpu.vector_store %arg5[%c0_8, %c0_9, %c0_10], %14 {strides = array<i32>} : memref<4x8x8xbf16, #tpu.memory_space<vmem>>, vector<1x8x8xbf16>,
    %15 = vector.extract_strided_slice %9 {offsets = [0, 8], sizes = [8, 8], strides = [1, 1]} : vector<8x16xf32> to vector<8x8xf32>
    %16 = arith.truncf %15 : vector<8x8xf32> to vector<8x8xbf16>
    %c0_11 = arith.constant 0 : index
    %c0_12 = arith.constant 0 : index
    %c0_13 = arith.constant 0 : index
    %17 = vector.load %arg6[%c0_11, %c0_12, %c0_13] : memref<4x8x8xbf16, #tpu.memory_space<vmem>>, vector<1x8x8xbf16>
    %18 = vector.shape_cast %17 : vector<1x8x8xbf16> to vector<8x8xbf16>
    %19 = vector.shape_cast %16 : vector<8x8xbf16> to vector<1x8x8xbf16>
    tpu.vector_store %arg6[%c0_11, %c0_12, %c0_13], %19 {strides = array<i32>} : memref<4x8x8xbf16, #tpu.memory_space<vmem>>, vector<1x8x8xbf16>,
    %c1 = arith.constant 1 : index
    %c0_14 = arith.constant 0 : index
    %c0_15 = arith.constant 0 : index
    %20 = vector.load %arg3[%c1, %c0_14, %c0_15] : memref<4x32x16xbf16, #tpu.memory_space<vmem>>, vector<1x32x16xbf16>
    %21 = vector.shape_cast %20 : vector<1x32x16xbf16> to vector<32x16xbf16>
    %cst_16 = arith.constant dense<0.000000e+00> : vector<8x16xf32>
    %22 = tpu.matmul %2, %21, %cst_16 {dimension_numbers = #tpu.dot_dimension_numbers<[1], [0], [0], [1], [0, 0, 1, 1], [], []>} : vector<8x32xbf16>, vector<32x16xbf16>, vector<8x16xf32> -> vector<8x16xf32>
    %c1_17 = arith.constant 1 : index
    %c0_18 = arith.constant 0 : index
    %c0_19 = arith.constant 0 : index
    %23 = vector.load %arg4[%c1_17, %c0_18, %c0_19] : memref<4x1x16xf32, #tpu.memory_space<vmem>>, vector<1x1x16xf32>
    %24 = vector.shape_cast %23 : vector<1x1x16xf32> to vector<1x16xf32>
    %25 = vector.broadcast %24 : vector<1x16xf32> to vector<8x16xf32>
    %26 = arith.addf %22, %25 : vector<8x16xf32>
    %27 = vector.extract_strided_slice %26 {offsets = [0, 0], sizes = [8, 8], strides = [1, 1]} : vector<8x16xf32> to vector<8x8xf32>
    %28 = arith.truncf %27 : vector<8x8xf32> to vector<8x8xbf16>
    %c1_20 = arith.constant 1 : index
    %c0_21 = arith.constant 0 : index
    %c0_22 = arith.constant 0 : index
    %29 = vector.load %arg5[%c1_20, %c0_21, %c0_22] : memref<4x8x8xbf16, #tpu.memory_space<vmem>>, vector<1x8x8xbf16>
    %30 = vector.shape_cast %29 : vector<1x8x8xbf16> to vector<8x8xbf16>
    %31 = vector.shape_cast %28 : vector<8x8xbf16> to vector<1x8x8xbf16>
    tpu.vector_store %arg5[%c1_20, %c0_21, %c0_22], %31 {strides = array<i32>} : memref<4x8x8xbf16, #tpu.memory_space<vmem>>, vector<1x8x8xbf16>,
    %32 = vector.extract_strided_slice %26 {offsets = [0, 8], sizes = [8, 8], strides = [1, 1]} : vector<8x16xf32> to vector<8x8xf32>
    %33 = arith.truncf %32 : vector<8x8xf32> to vector<8x8xbf16>
    %c1_23 = arith.constant 1 : index
    %c0_24 = arith.constant 0 : index
    %c0_25 = arith.constant 0 : index
    %34 = vector.load %arg6[%c1_23, %c0_24, %c0_25] : memref<4x8x8xbf16, #tpu.memory_space<vmem>>, vector<1x8x8xbf16>
    %35 = vector.shape_cast %34 : vector<1x8x8xbf16> to vector<8x8xbf16>
    %36 = vector.shape_cast %33 : vector<8x8xbf16> to vector<1x8x8xbf16>
    tpu.vector_store %arg6[%c1_23, %c0_24, %c0_25], %36 {strides = array<i32>} : memref<4x8x8xbf16, #tpu.memory_space<vmem>>, vector<1x8x8xbf16>,
    %c2 = arith.constant 2 : index
    %c0_26 = arith.constant 0 : index
    %c0_27 = arith.constant 0 : index
    %37 = vector.load %arg3[%c2, %c0_26, %c0_27] : memref<4x32x16xbf16, #tpu.memory_space<vmem>>, vector<1x32x16xbf16>
    %38 = vector.shape_cast %37 : vector<1x32x16xbf16> to vector<32x16xbf16>
    %cst_28 = arith.constant dense<0.000000e+00> : vector<8x16xf32>
    %39 = tpu.matmul %2, %38, %cst_28 {dimension_numbers = #tpu.dot_dimension_numbers<[1], [0], [0], [1], [0, 0, 1, 1], [], []>} : vector<8x32xbf16>, vector<32x16xbf16>, vector<8x16xf32> -> vector<8x16xf32>
    %c2_29 = arith.constant 2 : index
    %c0_30 = arith.constant 0 : index
    %c0_31 = arith.constant 0 : index
    %40 = vector.load %arg4[%c2_29, %c0_30, %c0_31] : memref<4x1x16xf32, #tpu.memory_space<vmem>>, vector<1x1x16xf32>
    %41 = vector.shape_cast %40 : vector<1x1x16xf32> to vector<1x16xf32>
    %42 = vector.broadcast %41 : vector<1x16xf32> to vector<8x16xf32>
    %43 = arith.addf %39, %42 : vector<8x16xf32>
    %44 = vector.extract_strided_slice %43 {offsets = [0, 0], sizes = [8, 8], strides = [1, 1]} : vector<8x16xf32> to vector<8x8xf32>
    %45 = arith.truncf %44 : vector<8x8xf32> to vector<8x8xbf16>
    %c2_32 = arith.constant 2 : index
    %c0_33 = arith.constant 0 : index
    %c0_34 = arith.constant 0 : index
    %46 = vector.load %arg5[%c2_32, %c0_33, %c0_34] : memref<4x8x8xbf16, #tpu.memory_space<vmem>>, vector<1x8x8xbf16>
    %47 = vector.shape_cast %46 : vector<1x8x8xbf16> to vector<8x8xbf16>
    %48 = vector.shape_cast %45 : vector<8x8xbf16> to vector<1x8x8xbf16>
    tpu.vector_store %arg5[%c2_32, %c0_33, %c0_34], %48 {strides = array<i32>} : memref<4x8x8xbf16, #tpu.memory_space<vmem>>, vector<1x8x8xbf16>,
    %49 = vector.extract_strided_slice %43 {offsets = [0, 8], sizes = [8, 8], strides = [1, 1]} : vector<8x16xf32> to vector<8x8xf32>
    %50 = arith.truncf %49 : vector<8x8xf32> to vector<8x8xbf16>
    %c2_35 = arith.constant 2 : index
    %c0_36 = arith.constant 0 : index
    %c0_37 = arith.constant 0 : index
    %51 = vector.load %arg6[%c2_35, %c0_36, %c0_37] : memref<4x8x8xbf16, #tpu.memory_space<vmem>>, vector<1x8x8xbf16>
    %52 = vector.shape_cast %51 : vector<1x8x8xbf16> to vector<8x8xbf16>
    %53 = vector.shape_cast %50 : vector<8x8xbf16> to vector<1x8x8xbf16>
    tpu.vector_store %arg6[%c2_35, %c0_36, %c0_37], %53 {strides = array<i32>} : memref<4x8x8xbf16, #tpu.memory_space<vmem>>, vector<1x8x8xbf16>,
    %c3 = arith.constant 3 : index
    %c0_38 = arith.constant 0 : index
    %c0_39 = arith.constant 0 : index
    %54 = vector.load %arg3[%c3, %c0_38, %c0_39] : memref<4x32x16xbf16, #tpu.memory_space<vmem>>, vector<1x32x16xbf16>
    %55 = vector.shape_cast %54 : vector<1x32x16xbf16> to vector<32x16xbf16>
    %cst_40 = arith.constant dense<0.000000e+00> : vector<8x16xf32>
    %56 = tpu.matmul %2, %55, %cst_40 {dimension_numbers = #tpu.dot_dimension_numbers<[1], [0], [0], [1], [0, 0, 1, 1], [], []>} : vector<8x32xbf16>, vector<32x16xbf16>, vector<8x16xf32> -> vector<8x16xf32>
    %c3_41 = arith.constant 3 : index
    %c0_42 = arith.constant 0 : index
    %c0_43 = arith.constant 0 : index
    %57 = vector.load %arg4[%c3_41, %c0_42, %c0_43] : memref<4x1x16xf32, #tpu.memory_space<vmem>>, vector<1x1x16xf32>
    %58 = vector.shape_cast %57 : vector<1x1x16xf32> to vector<1x16xf32>
    %59 = vector.broadcast %58 : vector<1x16xf32> to vector<8x16xf32>
    %60 = arith.addf %56, %59 : vector<8x16xf32>
    %61 = vector.extract_strided_slice %60 {offsets = [0, 0], sizes = [8, 8], strides = [1, 1]} : vector<8x16xf32> to vector<8x8xf32>
    %62 = arith.truncf %61 : vector<8x8xf32> to vector<8x8xbf16>
    %c3_44 = arith.constant 3 : index
    %c0_45 = arith.constant 0 : index
    %c0_46 = arith.constant 0 : index
    %63 = vector.load %arg5[%c3_44, %c0_45, %c0_46] : memref<4x8x8xbf16, #tpu.memory_space<vmem>>, vector<1x8x8xbf16>
    %64 = vector.shape_cast %63 : vector<1x8x8xbf16> to vector<8x8xbf16>
    %65 = vector.shape_cast %62 : vector<8x8xbf16> to vector<1x8x8xbf16>
    tpu.vector_store %arg5[%c3_44, %c0_45, %c0_46], %65 {strides = array<i32>} : memref<4x8x8xbf16, #tpu.memory_space<vmem>>, vector<1x8x8xbf16>,
    %66 = vector.extract_strided_slice %60 {offsets = [0, 8], sizes = [8, 8], strides = [1, 1]} : vector<8x16xf32> to vector<8x8xf32>
    %67 = arith.truncf %66 : vector<8x8xf32> to vector<8x8xbf16>
    %c3_47 = arith.constant 3 : index
    %c0_48 = arith.constant 0 : index
    %c0_49 = arith.constant 0 : index
    %68 = vector.load %arg6[%c3_47, %c0_48, %c0_49] : memref<4x8x8xbf16, #tpu.memory_space<vmem>>, vector<1x8x8xbf16>
    %69 = vector.shape_cast %68 : vector<1x8x8xbf16> to vector<8x8xbf16>
    %70 = vector.shape_cast %67 : vector<8x8xbf16> to vector<1x8x8xbf16>
    tpu.vector_store %arg6[%c3_47, %c0_48, %c0_49], %70 {strides = array<i32>} : memref<4x8x8xbf16, #tpu.memory_space<vmem>>, vector<1x8x8xbf16>,
    return
  }
  func.func @transform_0(%arg0: i32, %arg1: i32) -> (i32, i32, i32) {
    %c0_i32 = arith.constant 0 : i32
    %c0_i32_0 = arith.constant 0 : i32
    return %arg0, %arg1, %c0_i32 : i32, i32, i32
  }
  func.func @transform_1(%arg0: i32, %arg1: i32) -> (i32, i32, i32) {
    %c0_i32 = arith.constant 0 : i32
    %c0_i32_0 = arith.constant 0 : i32
    %c0_i32_1 = arith.constant 0 : i32
    %c0_i32_2 = arith.constant 0 : i32
    return %c0_i32, %c0_i32_0, %c0_i32_1 : i32, i32, i32
  }
  func.func @transform_2(%arg0: i32, %arg1: i32) -> (i32, i32, i32) {
    %c0_i32 = arith.constant 0 : i32
    %c0_i32_0 = arith.constant 0 : i32
    %c0_i32_1 = arith.constant 0 : i32
    %c0_i32_2 = arith.constant 0 : i32
    return %c0_i32, %c0_i32_0, %c0_i32_1 : i32, i32, i32
  }
  func.func @transform_3(%arg0: i32, %arg1: i32) -> (i32, i32, i32) {
    %c0_i32 = arith.constant 0 : i32
    %c0_i32_0 = arith.constant 0 : i32
    return %arg0, %arg1, %c0_i32 : i32, i32, i32
  }
  func.func @transform_4(%arg0: i32, %arg1: i32) -> (i32, i32, i32) {
    %c0_i32 = arith.constant 0 : i32
    %c0_i32_0 = arith.constant 0 : i32
    return %arg0, %arg1, %c0_i32 : i32, i32, i32
  }
}

</mosaic_0001>

<bundles_post_ra>
// kernel: tpu_custom_call.1
= control target key start
LH: loop header
LB: loop body
LE: loop exit
PB: predicated region body
PF: predicated region fallthrough
CT: control target
= control target key end

     0   :  { %10 = vsyncpa [#allocation3], 0  ;;  %s1030_s0 = inlined_call_operand.vmem [shape: f32[2,8,32], index: 0, kind: input, shape index: {}]   ;;  %s1031_s1 = inlined_call_operand.vmem [shape: bf16[4,32,16], index: 1, kind: input, shape index: {}]   ;;  %s1032_s2 = inlined_call_operand.vmem [shape: f32[4,1,16], index: 2, kind: input, shape index: {}]   ;;  %s1033_s3 = inlined_call_operand.hbm [shape: bf16[8,8,8], index: 3, kind: output, shape index: {0}]   ;;  %s1034_s4 = inlined_call_operand.hbm [shape: bf16[8,8,8], index: 4, kind: output, shape index: {1}]  }
   0x1   :  { %12 = vsyncpa [#allocation3 + $0x1], 0 }
   0x2   :  { %13 = vsyncpa [#allocation5], 0 }
   0x3   :  { %15 = vsyncpa [#allocation5 + $0x1], 0  ;;  %s853_s15 = smov 0   ;;  %s855_s16 = smov 0  }
   0x4   :  { %s857_s17 = smov 0   ;;  %s859_s18 = smov 0  }
   0x5   :  { %s861_s19 = smov 0   ;;  %s863_s20 = smov 0  }
   0x6 LB: > { %s563_s21 = sadd.s32 4294967295, %s823_s20   ;;  %s564_s22 = sadd.s32 4294967294, %s823_s20   ;;  %s823_s20 = sphi %s863_s20, %s21_s20   ;;  %s819_s19 = sphi %s861_s19, %s1041_s19   ;;  %s815_s18 = sphi %s859_s18, %s1040_s18   ;;  %s811_s17 = sphi %s857_s17, %s1039_s17   ;;  %s807_s16 = sphi %s855_s16, %s1038_s16   ;;  %s803_s15 = sphi %s853_s15, %s1037_s15  }
   0x7   : > { %s33_s23 = sadd.s32 1, %s819_s19  ;;  %s112_s24 = sadd.s32 1, %s811_s17 }
   0x8   : > { %p35_p0 = scmp.ge.s32.totalorder %s33_s23, 2  ;;  %p122_p1 = scmp.ne.s32.totalorder %s811_s17, %s807_s16 }
   0x9   : > { %p123_p2 = scmp.eq.s32.totalorder %s563_s21, 1  ;;  %p128_p3 = scmp.ne.s32.totalorder %s807_s16, %s803_s15 }
   0xa   : > { %s1043_s23 = smov (%p35_p0, %s33_s23), 0  ;;  %p129_p5 = scmp.eq.s32.totalorder %s564_s22, 1 }
   0xb   : > { %p893_p4 = por %p123_p2, %p122_p1  ;;  %s107_s26 = ssub.s32 %s819_s19, %s1043_s23 }
   0xc   : > { %p567_p6 = scmp.ge.s32.totalorder %s823_s20, 1  ;;  %p110_p7 = scmp.eq.s32.totalorder %s107_s26, 0 }
   0xd   : > { %p900_p8 = por %p129_p5, %p128_p3  ;;  %p191_p9 = scmp.lt.s32.totalorder %s823_s20, 3 }
   0xe   : > { %s906_s28 = scalar_select %p110_p7, %s811_s17, %s112_s24  }
   0xf   : > { %p192_p10 = pnand %p567_p6, %p191_p9 }
  0x10   : > { %p224_p11 = scmp.lt.s32.totalorder (!%p192_p10), %s815_s18, 1  ;;  %s938_s8 = sand.u32 (!%p192_p10), 1, %s807_s16  }
  0x11   : > { %195 = sbr.rel (%p192_p10) target bundleno = 293 (0x125), region = 32  ;;  %s568_s11 = sshll.u32 (!%p192_p10), %s938_s8, 4 }
  0x12   : > { %s216_s29 = scalar_lea.vmem (!%p192_p10), [#allocation2], %s568_s11  ;;  %s825_s30 = smov (!%p192_p10), 120  }
  0x13   : > { %s432_s9 = sshll.u32 (!%p192_p10), %s216_s29, 4  ;;  %s414_s12 = scalar_lea.sflag (!%p192_p10), [#allocation3], %s938_s8  ;;  %s433_s9 = int_to_ptr.vmem [resolvable:$true] %s432_s9 }
  0x14   : > { %s733_s24 = scalar_lea.hbm (!%p192_p10), %s1033_s3, 32 }
  0x16   : > { %v637_v0 = vld [vmem:[%s1031_s1 + $0x8] sm:$0xff]  ;;  %v643_v2 = vld [vmem:[%s1031_s1 + $0x38] sm:$0xff]  ;;  %v636_v3 = vld [vmem:[%s1031_s1] sm:$0xff]  ;;  %s225_s21 = scalar_select %p224_p11, %s815_s18, 1  ;;  %vm256_vm0 = vcmask 261120   ;;  %vm274_vm1 = vcmask 60416  }
  0x17   : > { %v641_v1 = vld [vmem:[%s1031_s1 + $0x28] sm:$0xff]  ;;  %266 = vmatpush.bf16.msra.mxu0 %v637_v0  ;;  %v640_v4 = vld [vmem:[%s1031_s1 + $0x20] sm:$0xff]  ;;  %v639_v5 = vld [vmem:[%s1031_s1 + $0x18] sm:$0xff]  ;;  %397 = vmatpush.bf16.msra.mxu3 %v643_v2 }
  0x18   : > { %353 = vmatpush.bf16.msra.mxu2 %v641_v1  ;;  %v642_v6 = vld [vmem:[%s1031_s1 + $0x30] sm:$0xff]  ;;  %309 = vmatpush.bf16.msra.mxu1 %v639_v5  ;;  %s570_s26 = sshll.u32 %s225_s21, 3  ;;  %v709_v10 = vld [vmem:[%s1032_s2] ss:$0 sm:$0xff]  ;;  %v710_v11 = vld [vmem:[%s1032_s2 + $0x1] ss:$0 sm:$0xff] }
  0x19   : > { %v638_v7 = vld [vmem:[%s1031_s1 + $0x10] sm:$0xff]  ;;  %s230_s7 = scalar_lea.vmem %s1030_s0, %s570_s26  ;;  %v711_v17 = vld [vmem:[%s1032_s2 + $0x2] ss:$0 sm:$0xff]  ;;  %v712_v18 = vld [vmem:[%s1032_s2 + $0x3] ss:$0 sm:$0xff]  ;;  %s644_s26 = sshll.u32 %s815_s18, 4 }
  0x1a   : > { %v234_v8 = vld [vmem:[%s230_s7] sm:$0xff]  ;;  %s431_s7 = scalar_lea.hbm %s1033_s3, %s644_s26 }
  0x1b   : > { %267 = vmatpush.bf16.msra.mxu0 %v636_v3  ;;  %398 = vmatpush.bf16.msra.mxu3 %v642_v6  ;;  %v235_v9 = vpack.c.bf16 %v234_v8, %v234_v8  ;;  %s434_s10 = sshll.u32 %s431_s7, 4  ;;  %s435_s10 = int_to_ptr.hbm [resolvable:$true] %s434_s10 }
  0x1c   : > { %354 = vmatpush.bf16.msra.mxu2 %v640_v4  ;;  %310 = vmatpush.bf16.msra.mxu1 %v638_v7  ;;  %s727_s13 = sshra.s32 %s435_s10, 4  ;;  %s728_s13 = int_to_ptr.hbm [resolvable:$true] %s727_s13 }
  0x1d   : > { %s729_s14 = scalar_lea.hbm %s728_s13, 16  ;;  %p734_p1 = scmp.lt.s32.totalorder %s728_s13, %s1033_s3 }
  0x1e   : > { %579 = vmatmul.msk.bf16.vlgmr.msra.gmra.mxu0 %vm256_vm0, %v235_v9  ;;  %625 = vmatmul.msk.bf16.vlgmr.msra.gmra.mxu3 %vm256_vm0, %v235_v9  ;;  %p730_p12 = scmp.ne.s32.totalorder %s728_s13, %s729_s14  ;;  %p735_p2 = scmp.lt.s32.totalorder %s733_s24, %s729_s14 }
  0x1f   : > { %609 = vmatmul.msk.bf16.vlgmr.msra.gmra.mxu2 %vm256_vm0, %v235_v9  ;;  %593 = vmatmul.msk.bf16.vlgmr.msra.gmra.mxu1 %vm256_vm0, %v235_v9 }
  0x20   : > { %p731_p13 = pnand %p730_p12, %p893_p4  ;;  %p736_p3 = por %p735_p2, %p734_p1 }
  0x22   : > { %p732_p0 = pneg %p731_p13 }
  0x24   : > { %p737_p5 = pnand %p736_p3, %p732_p0 }
  0x9b   : > { %v269_v12 = vpop.f32.mrf.mxu0 }
  0x9c   : > { %v270_v13 = vadd.f32 %v709_v10, %v269_v12  ;;  %v312_v14 = vpop.f32.mrf.mxu1 }
  0x9d   : > { %v313_v16 = vadd.f32 %v710_v11, %v312_v14 }
  0x9e   : > { %v273_v15 = vpack.c.bf16 %v270_v13, %v270_v13 }
  0x9f   : > { %v316_v19 = vpack.c.bf16 %v313_v16, %v313_v16 }
  0xa0   : > { %275 = vst.msk [vmem:[%s216_s29] sm:$0xf] %vm274_vm1, %v273_v15  ;;  %277 = vrot.lane.b32.xlu0 %v273_v15, %s825_s30 }
  0xa1   : > { %594 = vst.msk [vmem:[%s216_s29 + $0x4] sm:$0xf] %vm274_vm1, %v316_v19  ;;  %v400_v22 = vpop.f32.mrf.mxu3 }
  0xa2   : > { %v356_v20 = vpop.f32.mrf.mxu2  ;;  %v401_v23 = vadd.f32 %v712_v18, %v400_v22 }
  0xa3   : > { %v357_v21 = vadd.f32 %v711_v17, %v356_v20  ;;  %v271_v24 = vpop.f32.mrf.mxu0 }
  0xa4   : > { %v404_v26 = vpack.c.bf16 %v401_v23, %v401_v23  ;;  %v314_v27 = vpop.f32.mrf.mxu1 }
  0xa5   : > { %v360_v25 = vpack.c.bf16 %v357_v21, %v357_v21 }
  0xa6   : > { %626 = vst.msk [vmem:[%s216_s29 + $0xc] sm:$0xf] %vm274_vm1, %v404_v26 }
  0xa7   : > { %610 = vst.msk [vmem:[%s216_s29 + $0x8] sm:$0xf] %vm274_vm1, %v360_v25  ;;  %364 = vrot.lane.b32.xlu1 %v360_v25, %s825_s30 }
  0xa8   : > { %320 = vrot.lane.b32.xlu0 %v316_v19, %s825_s30 }
  0xaa   : > { %v358_v28 = vpop.f32.mrf.mxu2 }
  0xab   : > { %740 = shalt.err (!%p737_p5)
}
  0xac   : > { %s826_s29 = smov 64   ;;  %s827_s7 = smov 4   ;;  %v402_v29 = vpop.f32.mrf.mxu3 }
  0xad   : > { %646 = dma.vmem_to_hbm [thread:$0]  (%p893_p4), %s433_s9, 256, %s435_s10, %s414_s12, %s826_s29, %s826_s29, %s827_s7  }
  0xae   : > { %s223_s13 = scalar_lea.vmem [#allocation4], %s568_s11  ;;  %s449_s22 = scalar_lea.hbm %s1034_s4, %s644_s26 }
  0xaf   : > { %408 = vrot.lane.b32.xlu1 %v404_v26, %s825_s30  ;;  %s450_s9 = sshll.u32 %s223_s13, 4  ;;  %s452_s10 = sshll.u32 %s449_s22, 4  ;;  %s451_s9 = int_to_ptr.vmem [resolvable:$true] %s450_s9  ;;  %s453_s10 = int_to_ptr.hbm [resolvable:$true] %s452_s10 }
  0xb0   : > { %s419_s11 = scalar_lea.sflag [#allocation5], %s938_s8  ;;  %s755_s30 = sshra.s32 %s453_s10, 4  ;;  %s756_s30 = int_to_ptr.hbm [resolvable:$true] %s755_s30 }
  0xb1   : > { %s757_s12 = scalar_lea.hbm %s756_s30, 16  ;;  %s761_s24 = scalar_lea.hbm %s1034_s4, 32 }
  0xb2   : > { %p758_p6 = scmp.ne.s32.totalorder %s756_s30, %s757_s12  ;;  %p762_p10 = scmp.lt.s32.totalorder %s756_s30, %s1034_s4 }
  0xb3   : > { %p763_p11 = scmp.lt.s32.totalorder %s761_s24, %s757_s12 }
  0xb4   : > { %p759_p7 = pnand %p758_p6, %p893_p4 }
  0xb5   : > { %p764_p12 = por %p763_p11, %p762_p10 }
  0xb6   : > { %p760_p9 = pneg %p759_p7 }
  0xb8   : > { %p765_p13 = pnand %p764_p12, %p760_p9 }
 0x112   : > { %v278_v30 = vpop.permute.xlu0 %277 }
 0x113   : > { %280 = vst.msk [vmem:[%s223_s13] sm:$0xf] %vm274_vm1, %v278_v30 }
 0x119   : > { %v365_v31 = vpop.permute.xlu1 %364 }
 0x11a   : > { %611 = vst.msk [vmem:[%s223_s13 + $0x8] sm:$0xf] %vm274_vm1, %v365_v31  ;;  %v321_v32 = vpop.permute.xlu0 %320 }
 0x11b   : > { %595 = vst.msk [vmem:[%s223_s13 + $0x4] sm:$0xf] %vm274_vm1, %v321_v32 }
 0x121   : > { %v409_v33 = vpop.permute.xlu1 %408 }
 0x122   : > { %627 = vst.msk [vmem:[%s223_s13 + $0xc] sm:$0xf] %vm274_vm1, %v409_v33 }
 0x123   : > { %768 = shalt.err (!%p765_p13)
}
 0x124   : > { %647 = dma.vmem_to_hbm [thread:$0]  (%p893_p4), %s451_s9, 256, %s453_s10, %s419_s11, %s826_s29, %s826_s29, %s827_s7  }
 0x125 PF: > { %p657_p0 = scmp.ge.s32.totalorder %s823_s20, 2  ;;  %s467_s8 = sand.u32 1, %s803_s15  }
 0x126   : > { %s468_s13 = scalar_lea.sflag [#allocation3], %s467_s8 }
 0x127   : > { %p651_p1 = pnand %p657_p0, %p900_p8 }
 0x129   : > { %p652_p2 = pneg %p651_p1 }
 0x12b   : > { %794 = dma.done.wait (%p652_p2), %s468_s13, 256  }
 0x12c   : > { %796 = vsyncadd (%p652_p2), %s468_s13, 4294967040  ;;  %s478_s14 = scalar_lea.sflag [#allocation5], %s467_s8 }
 0x12d   : > { %798 = dma.done.wait (%p652_p2), %s478_s14, 256  }
 0x12e   : > { %800 = vsyncadd (%p652_p2), %s478_s14, 4294967040  ;;  %s21_s20 = sadd.s32 1, %s823_s20   ;;  %s1037_s15 = smov %s807_s16 }
 0x12f   : > { %p18_p3 = scmp.ge.s32.totalorder %s21_s20, 4   ;;  %s1038_s16 = smov %s811_s17 }
 0x130   : > { %s1039_s17 = smov %s906_s28  ;;  %s1040_s18 = smov %s819_s19 }
 0x131   : > { %s1041_s19 = smov %s1043_s23  ;;  %20 = sbr.rel (!%p18_p3) target bundleno = 6 (0x6), region = 96 }
 0x136   :  { %484 = vsyncpa [#allocation3], 1 }
 0x137   :  { %486 = vsyncpa [#allocation3 + $0x1], 1 }
 0x138   :  { %487 = vsyncpa [#allocation5], 1 }
 0x139   :  { %489 = vsyncpa [#allocation5 + $0x1], 1 }

</bundles_post_ra>
